<compile_context>
chip_gen: v5e
topology: v5e:2x2
jax: 0.10.0
libtpu: 0.0.40
codegen_flags: <defaults>
</compile_context>

<pallas_src>
import functools
import math

import jax
import jax.numpy as jnp
from jax.experimental import pallas as pl
from jax.experimental.pallas import tpu as pltpu


def _split_heads(p, n_heads, d_head, bb, s):
    """(bb*s, H*dh) -> (bb*H, s, dh) with one lane-aware relayout."""
    p4 = p.reshape(bb, s, n_heads, d_head)       # fold head groups out of the lane dim
    p4 = pltpu.einshape("bshd->bhsd", p4)        # single relayout (major <-> sublane)
    return p4.reshape(bb * n_heads, s, d_head)   # merge majors (free)


def _merge_heads(ctx, n_heads, d_head, bb, s):
    """(bb*H, s, dh) -> (bb*s, H*dh): inverse of _split_heads, lane-contiguous heads."""
    c4 = ctx.reshape(bb, n_heads, s, d_head)     # split majors (free)
    c4 = pltpu.einshape("bhsd->bshd", c4)        # single relayout
    return c4.reshape(bb * s, n_heads * d_head)  # heads back onto the lane dim


def mha_kernel(*refs, n_heads, d_k, d_v, eps, mxu_dtype, fused_qkv, return_attn):
    if fused_qkv:
        xq_ref, mask_ref, wqkv_ref, wfc_ref = refs[:4]
        out_refs = refs[4:]
    else:
        xq_ref, xk_ref, xv_ref, mask_ref, wq_ref, wk_ref, wv_ref, wfc_ref = refs[:8]
        out_refs = refs[8:]
    out_ref = out_refs[0]
    attn_ref = out_refs[1] if return_attn else None

    Bb, S, D = xq_ref.shape
    H = n_heads
    M = Bb * S
    Hdk = H * d_k
    Hdv = H * d_v

    # ---- projections: big-M matmuls, bf16 MXU operands, f32 accumulation ----
    resid = xq_ref[...].reshape(M, D)                       # f32 residual (free reshape)
    if fused_qkv:
        # Self-attention fast path: one (M, D) x (D, 2*Hdk+Hdv) projection.
        qkv = jnp.dot(resid.astype(mxu_dtype), wqkv_ref[...],
                      preferred_element_type=jnp.float32)   # (M, 2*Hdk+Hdv)
        q = qkv[:, :Hdk]
        k = qkv[:, Hdk:2 * Hdk]
        v = qkv[:, 2 * Hdk:]
    else:
        q = jnp.dot(resid.astype(mxu_dtype), wq_ref[...],
                    preferred_element_type=jnp.float32)     # (M, Hdk)
        k = jnp.dot(xk_ref[...].reshape(M, D).astype(mxu_dtype), wk_ref[...],
                    preferred_element_type=jnp.float32)     # (M, Hdk)
        v = jnp.dot(xv_ref[...].reshape(M, D).astype(mxu_dtype), wv_ref[...],
                    preferred_element_type=jnp.float32)     # (M, Hdv)

    # Fold the 1/sqrt(d_k) scale into Q once.
    q = q * (1.0 / math.sqrt(d_k))

    # ---- head split: one relayout per tensor (no per-head slices / stack) ---
    qh = _split_heads(q, H, d_k, Bb, S).astype(mxu_dtype)   # (Bb*H, S, dk)
    kh = _split_heads(k, H, d_k, Bb, S).astype(mxu_dtype)   # (Bb*H, S, dk)
    vh = _split_heads(v, H, d_v, Bb, S).astype(mxu_dtype)   # (Bb*H, S, dv)

    # ---- scores: single head-batched matmul, no explicit K^T ----------------
    scores = jnp.einsum('bqd,bkd->bqk', qh, kh,
                        preferred_element_type=jnp.float32)  # (Bb*H, S, S)
    scores = scores.reshape(Bb, H, S, S)
    mask = mask_ref[...]                                     # (Bb, S, S); 1.0 = masked
    scores = jnp.where(mask[:, None, :, :] > 0.0, jnp.float32(-1e9), scores)

    # ---- softmax in f32 with exact normalization (probs sum to 1) -----------
    m = jnp.max(scores, axis=-1, keepdims=True)
    e = jnp.exp(scores - m)
    attn = e / jnp.sum(e, axis=-1, keepdims=True)            # (Bb, H, S, S) f32
    if attn_ref is not None:
        attn_ref[...] = attn.astype(attn_ref.dtype)           # bf16 writeback

    # ---- context + lane-contiguous head merge (no masked scratch stores) ----
    ctx = jnp.einsum('bqk,bkd->bqd',
                     attn.reshape(Bb * H, S, S).astype(mxu_dtype), vh,
                     preferred_element_type=jnp.float32)      # (Bb*H, S, dv)
    ctx = _merge_heads(ctx, H, d_v, Bb, S).astype(mxu_dtype)  # (M, H*dv)

    # ---- output projection (contracts full H*dv lanes) + residual -----------
    out = jnp.dot(ctx, wfc_ref[...], preferred_element_type=jnp.float32) + resid

    # ---- LayerNorm (fresh params: weight=1, bias=0); two-pass, f32 ----------
    mean = jnp.mean(out, axis=-1, keepdims=True)
    cen = out - mean
    var = jnp.mean(cen * cen, axis=-1, keepdims=True)
    y = cen * jax.lax.rsqrt(var + eps)
    out_ref[...] = y.reshape(Bb, S, D)


def multi_head_attention(input_Q, input_K, input_V, attn_mask,
                         W_Q, W_K, W_V, W_fc,
                         *, n_heads, d_k, d_v, eps=1e-5,
                         mxu_dtype=jnp.bfloat16, attn_dtype=jnp.bfloat16,
                         block_b=None, return_attn=True):
    B, S, D = input_Q.shape
    Hdk = n_heads * d_k
    Hdv = n_heads * d_v
    assert W_Q.shape == (D, Hdk) and W_K.shape == (D, Hdk)
    assert W_V.shape == (D, Hdv) and W_fc.shape == (Hdv, D)
    assert attn_mask.shape == (B, S, S)

    # Self-attention fast path when the same tensor is passed for Q/K/V.
    fused_qkv = (input_K is input_Q) and (input_V is input_Q)

    if block_b is None:
        # Keep M = block_b*S large (target >= 256 rows) for sublane-efficient
        # projection matmuls ...
        block_b = max(1, min(B, max(1, 256 // max(S, 1))))
        # ... but keep at least two grid steps when B allows so both v7x
        # TensorCores get work under dimension_semantics=("parallel",).
        if B >= 2:
            block_b = min(block_b, B // 2)
        while B % block_b:
            block_b -= 1
    assert B % block_b == 0
    grid = (B // block_b,)

    # Weights to the MXU in bf16. Ideally the model stores them persistently in
    # bf16 (and the fused qkv concat is done once at init) so these are no-ops.
    cast = lambda w: w if w.dtype == mxu_dtype else w.astype(mxu_dtype)
    wfc = cast(W_fc)
    mask_spec = pl.BlockSpec((block_b, S, S), lambda g: (g, 0, 0))
    x_spec = pl.BlockSpec((block_b, S, D), lambda g: (g, 0, 0))

    if fused_qkv:
        wqkv = jnp.concatenate([cast(W_Q), cast(W_K), cast(W_V)], axis=1)
        args = (input_Q, attn_mask, wqkv, wfc)
        in_specs = [
            x_spec,
            mask_spec,
            pl.BlockSpec((D, 2 * Hdk + Hdv), lambda g: (0, 0)),
            pl.BlockSpec((Hdv, D), lambda g: (0, 0)),
        ]
    else:
        args = (input_Q, input_K, input_V, attn_mask,
                cast(W_Q), cast(W_K), cast(W_V), wfc)
        in_specs = [
            x_spec, x_spec, x_spec,
            mask_spec,
            pl.BlockSpec((D, Hdk), lambda g: (0, 0)),
            pl.BlockSpec((D, Hdk), lambda g: (0, 0)),
            pl.BlockSpec((D, Hdv), lambda g: (0, 0)),
            pl.BlockSpec((Hdv, D), lambda g: (0, 0)),
        ]

    out_shapes = [jax.ShapeDtypeStruct((B, S, D), jnp.float32)]
    out_specs = [pl.BlockSpec((block_b, S, D), lambda g: (g, 0, 0))]
    if return_attn:
        out_shapes.append(jax.ShapeDtypeStruct((B, n_heads, S, S), attn_dtype))
        out_specs.append(
            pl.BlockSpec((block_b, n_heads, S, S), lambda g: (g, 0, 0, 0)))

    # Rough VMEM budget: double-buffered I/O blocks + f32 intermediates + slack.
    n_x = 1 if fused_qkv else 3
    x_block = block_b * S * D * 4
    mask_block = block_b * S * S * 4
    w_bytes = ((D * (2 * Hdk + Hdv) + Hdv * D) * 2 if fused_qkv
               else (2 * D * Hdk + D * Hdv + Hdv * D) * 2)
    out_block = block_b * S * D * 4
    attn_block = block_b * n_heads * S * S * 2 if return_attn else 0
    interm = block_b * (3 * S * (2 * Hdk + Hdv) * 4 + 4 * n_heads * S * S * 4)
    est = 2 * (n_x * x_block + mask_block + w_bytes + out_block + attn_block) + interm
    vmem_limit = int(min(48 * 2 ** 20, max(16 * 2 ** 20, 2 * est)))

    kernel = functools.partial(
        mha_kernel, n_heads=n_heads, d_k=d_k, d_v=d_v, eps=eps,
        mxu_dtype=mxu_dtype, fused_qkv=fused_qkv, return_attn=return_attn)

    outs = pl.pallas_call(
        kernel,
        out_shape=tuple(out_shapes),
        grid=grid,
        in_specs=in_specs,
        out_specs=tuple(out_specs),
        compiler_params=pltpu.CompilerParams(
            dimension_semantics=("parallel",),
            vmem_limit_bytes=vmem_limit),
    )(*args)

    return outs if return_attn else outs[0]


def _reference(input_Q, input_K, input_V, attn_mask, W_Q, W_K, W_V, W_fc,
               *, n_heads, d_k, d_v, eps=1e-5):
    """Pure-JAX f32 reference mirroring the PyTorch forward."""
    B, S, D = input_Q.shape
    Q = (input_Q @ W_Q).reshape(B, S, n_heads, d_k).transpose(0, 2, 1, 3)
    K = (input_K @ W_K).reshape(B, S, n_heads, d_k).transpose(0, 2, 1, 3)
    V = (input_V @ W_V).reshape(B, S, n_heads, d_v).transpose(0, 2, 1, 3)
    mask = attn_mask[:, None, :, :] > 0
    scores = jnp.einsum("bhqd,bhkd->bhqk", Q, K) / math.sqrt(d_k)
    scores = jnp.where(mask, -1e9, scores)
    attn = jax.nn.softmax(scores, axis=-1)
    context = jnp.einsum("bhqk,bhkd->bhqd", attn, V)
    context = context.transpose(0, 2, 1, 3).reshape(B, S, n_heads * d_v)
    out = context @ W_fc + input_Q
    mean = out.mean(-1, keepdims=True)
    var = ((out - mean) ** 2).mean(-1, keepdims=True)
    return (out - mean) / jnp.sqrt(var + eps), attn


if __name__ == "__main__":
    # args: d_model=32, d_k=d_v=8, n_heads=4; batch=2, seq=8
    B, S, d_model, n_heads, d_k, d_v = 2, 8, 32, 4, 8, 8

    key = jax.random.PRNGKey(0)
    kx, kk, kv, kwq, kwk, kwv, kwf = jax.random.split(key, 7)

    x_q = jax.random.normal(kx, (B, S, d_model), dtype=jnp.float32)
    x_k = jax.random.normal(kk, (B, S, d_model), dtype=jnp.float32)
    x_v = jax.random.normal(kv, (B, S, d_model), dtype=jnp.float32)

    # Deterministic "nn.Linear" weights (bias=False), stored as [in, out].
    s = 1.0 / math.sqrt(d_model)
    W_Q = jax.random.uniform(kwq, (d_model, n_heads * d_k), jnp.float32, -s, s)
    W_K = jax.random.uniform(kwk, (d_model, n_heads * d_k), jnp.float32, -s, s)
    W_V = jax.random.uniform(kwv, (d_model, n_heads * d_v), jnp.float32, -s, s)
    sf = 1.0 / math.sqrt(n_heads * d_v)
    W_fc = jax.random.uniform(kwf, (n_heads * d_v, d_model), jnp.float32, -sf, sf)

    # Boolean-style attention mask (1.0 = masked): padding on the last 2 keys.
    attn_mask = jnp.zeros((B, S, S), dtype=jnp.float32).at[:, :, -2:].set(1.0)

    # Model-level bf16 weights (persistent, per review): cast once here.
    W_Qb, W_Kb, W_Vb, W_fcb = (w.astype(jnp.bfloat16) for w in (W_Q, W_K, W_V, W_fc))

    # ---- self-attention (exercises the fused-QKV fast path) -----------------
    out_sa, attn_sa = multi_head_attention(
        x_q, x_q, x_q, attn_mask, W_Qb, W_Kb, W_Vb, W_fcb,
        n_heads=n_heads, d_k=d_k, d_v=d_v)
    out_sa, attn_sa = jax.block_until_ready((out_sa, attn_sa))
    ref_out_sa, ref_attn_sa = _reference(
        x_q, x_q, x_q, attn_mask, W_Q, W_K, W_V, W_fc,
        n_heads=n_heads, d_k=d_k, d_v=d_v)
    assert jnp.allclose(attn_sa.astype(jnp.float32), ref_attn_sa, atol=1e-2, rtol=1e-2)
    assert jnp.allclose(out_sa, ref_out_sa, atol=3e-2, rtol=3e-2)

    # ---- cross-attention (separate Q/K/V projections) ------------------------
    out_ca, attn_ca = multi_head_attention(
        x_q, x_k, x_v, attn_mask, W_Qb, W_Kb, W_Vb, W_fcb,
        n_heads=n_heads, d_k=d_k, d_v=d_v)
    out_ca, attn_ca = jax.block_until_ready((out_ca, attn_ca))
    ref_out_ca, ref_attn_ca = _reference(
        x_q, x_k, x_v, attn_mask, W_Q, W_K, W_V, W_fc,
        n_heads=n_heads, d_k=d_k, d_v=d_v)
    assert jnp.allclose(attn_ca.astype(jnp.float32), ref_attn_ca, atol=1e-2, rtol=1e-2)
    assert jnp.allclose(out_ca, ref_out_ca, atol=3e-2, rtol=3e-2)

    print("KERNEL_OK")
</pallas_src>

<mosaic_0001>
module attributes {stable_mosaic.version = 11 : i64} {
  func.func @mha_kernel(%arg0: i32, %arg1: memref<1x8x32xf32, #tpu.memory_space<vmem>>, %arg2: memref<1x8x8xf32, #tpu.memory_space<vmem>>, %arg3: memref<32x96xbf16, #tpu.memory_space<vmem>>, %arg4: memref<32x32xbf16, #tpu.memory_space<vmem>>, %arg5: memref<1x8x32xf32, #tpu.memory_space<vmem>>, %arg6: memref<1x4x8x8xbf16, #tpu.memory_space<vmem>>) attributes {dimension_semantics = [#tpu.dimension_semantics<parallel>], iteration_bounds = array<i64: 2>, scalar_prefetch = 0 : i64, scratch_operands = 0 : i64, tpu.core_type = #tpu.core_type<tc>, window_params = [{transform_indices = @transform_0, window_bounds = array<i64: 1, 8, 32>}, {transform_indices = @transform_1, window_bounds = array<i64: 1, 8, 8>}, {pipeline_mode = #tpu.pipeline_mode<synchronous>, transform_indices = @transform_2, window_bounds = array<i64: 32, 96>}, {pipeline_mode = #tpu.pipeline_mode<synchronous>, transform_indices = @transform_3, window_bounds = array<i64: 32, 32>}, {transform_indices = @transform_4, window_bounds = array<i64: 1, 8, 32>}, {transform_indices = @transform_5, window_bounds = array<i64: 1, 4, 8, 8>}]} {
    %c0 = arith.constant 0 : index
    %c0_0 = arith.constant 0 : index
    %c0_1 = arith.constant 0 : index
    %0 = vector.load %arg1[%c0, %c0_0, %c0_1] : memref<1x8x32xf32, #tpu.memory_space<vmem>>, vector<1x8x32xf32>
    %1 = vector.shape_cast %0 : vector<1x8x32xf32> to vector<8x32xf32>
    %2 = arith.truncf %1 : vector<8x32xf32> to vector<8x32xbf16>
    %c0_2 = arith.constant 0 : index
    %c0_3 = arith.constant 0 : index
    %3 = vector.load %arg3[%c0_2, %c0_3] : memref<32x96xbf16, #tpu.memory_space<vmem>>, vector<32x96xbf16>
    %cst = arith.constant dense<0.000000e+00> : vector<8x96xf32>
    %4 = tpu.matmul %2, %3, %cst {dimension_numbers = #tpu.dot_dimension_numbers<[1], [0], [0], [1], [0, 0, 1, 1], [], []>} : vector<8x32xbf16>, vector<32x96xbf16>, vector<8x96xf32> -> vector<8x96xf32>
    %5 = vector.extract_strided_slice %4 {offsets = [0, 0], sizes = [8, 32], strides = [1, 1]} : vector<8x96xf32> to vector<8x32xf32>
    %6 = vector.extract_strided_slice %4 {offsets = [0, 32], sizes = [8, 32], strides = [1, 1]} : vector<8x96xf32> to vector<8x32xf32>
    %7 = vector.extract_strided_slice %4 {offsets = [0, 64], sizes = [8, 32], strides = [1, 1]} : vector<8x96xf32> to vector<8x32xf32>
    %cst_4 = arith.constant 0.353553385 : f32
    %8 = vector.broadcast %cst_4 : f32 to vector<8x32xf32>
    %9 = arith.mulf %5, %8 : vector<8x32xf32>
    %10 = vector.shape_cast %9 : vector<8x32xf32> to vector<1x8x4x8xf32>
    %11 = tpu.transpose %10, [0, 2, 1, 3] : vector<1x8x4x8xf32> -> vector<1x4x8x8xf32>
    %12 = vector.shape_cast %11 : vector<1x4x8x8xf32> to vector<4x8x8xf32>
    %13 = arith.truncf %12 : vector<4x8x8xf32> to vector<4x8x8xbf16>
    %14 = vector.shape_cast %6 : vector<8x32xf32> to vector<1x8x4x8xf32>
    %15 = tpu.transpose %14, [0, 2, 1, 3] : vector<1x8x4x8xf32> -> vector<1x4x8x8xf32>
    %16 = vector.shape_cast %15 : vector<1x4x8x8xf32> to vector<4x8x8xf32>
    %17 = arith.truncf %16 : vector<4x8x8xf32> to vector<4x8x8xbf16>
    %18 = vector.shape_cast %7 : vector<8x32xf32> to vector<1x8x4x8xf32>
    %19 = tpu.transpose %18, [0, 2, 1, 3] : vector<1x8x4x8xf32> -> vector<1x4x8x8xf32>
    %20 = vector.shape_cast %19 : vector<1x4x8x8xf32> to vector<4x8x8xf32>
    %21 = arith.truncf %20 : vector<4x8x8xf32> to vector<4x8x8xbf16>
    "tpu.trace_start"() <{level = 10 : i32, message = "bqd,bkd->bqk"}> : () -> ()
    %cst_5 = arith.constant dense<0.000000e+00> : vector<4x8x8xf32>
    %22 = tpu.matmul %13, %17, %cst_5 {dimension_numbers = #tpu.dot_dimension_numbers<[2], [2], [1], [1], [0, 0, 0, 1, 1, 1], [0], [0]>} : vector<4x8x8xbf16>, vector<4x8x8xbf16>, vector<4x8x8xf32> -> vector<4x8x8xf32>
    "tpu.trace_stop"() : () -> ()
    %23 = vector.shape_cast %22 : vector<4x8x8xf32> to vector<1x4x8x8xf32>
    %c0_6 = arith.constant 0 : index
    %c0_7 = arith.constant 0 : index
    %c0_8 = arith.constant 0 : index
    %24 = vector.load %arg2[%c0_6, %c0_7, %c0_8] : memref<1x8x8xf32, #tpu.memory_space<vmem>>, vector<1x8x8xf32>
    %25 = vector.shape_cast %24 : vector<1x8x8xf32> to vector<1x1x8x8xf32>
    %cst_9 = arith.constant 0.000000e+00 : f32
    %26 = vector.broadcast %cst_9 : f32 to vector<1x1x8x8xf32>
    %27 = arith.cmpf ogt, %25, %26 : vector<1x1x8x8xf32>
    %cst_10 = arith.constant -1.000000e+09 : f32
    %28 = vector.shape_cast %27 : vector<1x1x8x8xi1> to vector<1x1x8x8xi1>
    %29 = vector.broadcast %28 : vector<1x1x8x8xi1> to vector<1x4x8x8xi1>
    %30 = vector.broadcast %cst_10 : f32 to vector<1x4x8x8xf32>
    %31 = arith.select %29, %30, %23 : vector<1x4x8x8xi1>, vector<1x4x8x8xf32>
    %cst_11 = arith.constant dense<0xFF800000> : vector<1x4x8xf32>
    %32 = vector.multi_reduction <maximumf>, %31, %cst_11 [3] : vector<1x4x8x8xf32> to vector<1x4x8xf32>
    %33 = vector.shape_cast %32 : vector<1x4x8xf32> to vector<1x4x8x1xf32>
    %34 = vector.broadcast %33 : vector<1x4x8x1xf32> to vector<1x4x8x8xf32>
    %35 = arith.subf %31, %34 : vector<1x4x8x8xf32>
    %36 = math.exp %35 : vector<1x4x8x8xf32>
    %cst_12 = arith.constant dense<0.000000e+00> : vector<1x4x8xf32>
    %37 = vector.multi_reduction <add>, %36, %cst_12 [3] : vector<1x4x8x8xf32> to vector<1x4x8xf32>
    %38 = vector.shape_cast %37 : vector<1x4x8xf32> to vector<1x4x8x1xf32>
    %39 = vector.broadcast %38 : vector<1x4x8x1xf32> to vector<1x4x8x8xf32>
    %40 = arith.divf %36, %39 : vector<1x4x8x8xf32>
    %41 = arith.truncf %40 : vector<1x4x8x8xf32> to vector<1x4x8x8xbf16>
    %c0_13 = arith.constant 0 : index
    %c0_14 = arith.constant 0 : index
    %c0_15 = arith.constant 0 : index
    %c0_16 = arith.constant 0 : index
    %42 = vector.load %arg6[%c0_13, %c0_14, %c0_15, %c0_16] : memref<1x4x8x8xbf16, #tpu.memory_space<vmem>>, vector<1x4x8x8xbf16>
    tpu.vector_store %arg6[%c0_13, %c0_14, %c0_15, %c0_16], %41 {strides = array<i32>} : memref<1x4x8x8xbf16, #tpu.memory_space<vmem>>, vector<1x4x8x8xbf16>,
    %43 = vector.shape_cast %40 : vector<1x4x8x8xf32> to vector<4x8x8xf32>
    %44 = arith.truncf %43 : vector<4x8x8xf32> to vector<4x8x8xbf16>
    "tpu.trace_start"() <{level = 10 : i32, message = "bqk,bkd->bqd"}> : () -> ()
    %cst_17 = arith.constant dense<0.000000e+00> : vector<4x8x8xf32>
    %45 = tpu.matmul %44, %21, %cst_17 {dimension_numbers = #tpu.dot_dimension_numbers<[2], [1], [1], [2], [0, 0, 0, 1, 1, 2], [0], [0]>} : vector<4x8x8xbf16>, vector<4x8x8xbf16>, vector<4x8x8xf32> -> vector<4x8x8xf32>
    "tpu.trace_stop"() : () -> ()
    %46 = vector.shape_cast %45 : vector<4x8x8xf32> to vector<1x4x8x8xf32>
    %47 = tpu.transpose %46, [0, 2, 1, 3] : vector<1x4x8x8xf32> -> vector<1x8x4x8xf32>
    %48 = vector.shape_cast %47 : vector<1x8x4x8xf32> to vector<8x32xf32>
    %49 = arith.truncf %48 : vector<8x32xf32> to vector<8x32xbf16>
    %c0_18 = arith.constant 0 : index
    %c0_19 = arith.constant 0 : index
    %50 = vector.load %arg4[%c0_18, %c0_19] : memref<32x32xbf16, #tpu.memory_space<vmem>>, vector<32x32xbf16>
    %cst_20 = arith.constant dense<0.000000e+00> : vector<8x32xf32>
    %51 = tpu.matmul %49, %50, %cst_20 {dimension_numbers = #tpu.dot_dimension_numbers<[1], [0], [0], [1], [0, 0, 1, 1], [], []>} : vector<8x32xbf16>, vector<32x32xbf16>, vector<8x32xf32> -> vector<8x32xf32>
    %52 = arith.addf %51, %1 : vector<8x32xf32>
    %cst_21 = arith.constant dense<0.000000e+00> : vector<8xf32>
    %53 = vector.multi_reduction <add>, %52, %cst_21 [1] : vector<8x32xf32> to vector<8xf32>
    %54 = vector.shape_cast %53 : vector<8xf32> to vector<8x1xf32>
    %cst_22 = arith.constant 3.200000e+01 : f32
    %55 = vector.broadcast %cst_22 : f32 to vector<8x1xf32>
    %56 = arith.divf %54, %55 : vector<8x1xf32>
    %57 = vector.broadcast %56 : vector<8x1xf32> to vector<8x32xf32>
    %58 = arith.subf %52, %57 : vector<8x32xf32>
    %59 = arith.mulf %58, %58 : vector<8x32xf32>
    %cst_23 = arith.constant dense<0.000000e+00> : vector<8xf32>
    %60 = vector.multi_reduction <add>, %59, %cst_23 [1] : vector<8x32xf32> to vector<8xf32>
    %61 = vector.shape_cast %60 : vector<8xf32> to vector<8x1xf32>
    %cst_24 = arith.constant 3.200000e+01 : f32
    %62 = vector.broadcast %cst_24 : f32 to vector<8x1xf32>
    %63 = arith.divf %61, %62 : vector<8x1xf32>
    %cst_25 = arith.constant 9.99999974E-6 : f32
    %64 = vector.broadcast %cst_25 : f32 to vector<8x1xf32>
    %65 = arith.addf %63, %64 : vector<8x1xf32>
    %66 = math.rsqrt %65 : vector<8x1xf32>
    %67 = vector.broadcast %66 : vector<8x1xf32> to vector<8x32xf32>
    %68 = arith.mulf %58, %67 : vector<8x32xf32>
    %69 = vector.shape_cast %68 : vector<8x32xf32> to vector<1x8x32xf32>
    %c0_26 = arith.constant 0 : index
    %c0_27 = arith.constant 0 : index
    %c0_28 = arith.constant 0 : index
    %70 = vector.load %arg5[%c0_26, %c0_27, %c0_28] : memref<1x8x32xf32, #tpu.memory_space<vmem>>, vector<1x8x32xf32>
    tpu.vector_store %arg5[%c0_26, %c0_27, %c0_28], %69 {strides = array<i32>} : memref<1x8x32xf32, #tpu.memory_space<vmem>>, vector<1x8x32xf32>,
    return
  }
  func.func @transform_0(%arg0: i32) -> (i32, i32, i32) {
    %c0_i32 = arith.constant 0 : i32
    %c0_i32_0 = arith.constant 0 : i32
    %c0_i32_1 = arith.constant 0 : i32
    return %arg0, %c0_i32, %c0_i32_0 : i32, i32, i32
  }
  func.func @transform_1(%arg0: i32) -> (i32, i32, i32) {
    %c0_i32 = arith.constant 0 : i32
    %c0_i32_0 = arith.constant 0 : i32
    %c0_i32_1 = arith.constant 0 : i32
    return %arg0, %c0_i32, %c0_i32_0 : i32, i32, i32
  }
  func.func @transform_2(%arg0: i32) -> (i32, i32) {
    %c0_i32 = arith.constant 0 : i32
    %c0_i32_0 = arith.constant 0 : i32
    %c0_i32_1 = arith.constant 0 : i32
    return %c0_i32, %c0_i32_0 : i32, i32
  }
  func.func @transform_3(%arg0: i32) -> (i32, i32) {
    %c0_i32 = arith.constant 0 : i32
    %c0_i32_0 = arith.constant 0 : i32
    %c0_i32_1 = arith.constant 0 : i32
    return %c0_i32, %c0_i32_0 : i32, i32
  }
  func.func @transform_4(%arg0: i32) -> (i32, i32, i32) {
    %c0_i32 = arith.constant 0 : i32
    %c0_i32_0 = arith.constant 0 : i32
    %c0_i32_1 = arith.constant 0 : i32
    return %arg0, %c0_i32, %c0_i32_0 : i32, i32, i32
  }
  func.func @transform_5(%arg0: i32) -> (i32, i32, i32, i32) {
    %c0_i32 = arith.constant 0 : i32
    %c0_i32_0 = arith.constant 0 : i32
    %c0_i32_1 = arith.constant 0 : i32
    %c0_i32_2 = arith.constant 0 : i32
    return %arg0, %c0_i32, %c0_i32_0, %c0_i32_1 : i32, i32, i32, i32
  }
}

</mosaic_0001>

<bundles_post_ra>
// kernel: tpu_custom_call.1
= control target key start
LH: loop header
LB: loop body
LE: loop exit
PB: predicated region body
PF: predicated region fallthrough
CT: control target
= control target key end

     0   :  { %s2286_s0 = inlined_call_operand.hbm [shape: f32[2,8,32], index: 0, kind: input, shape index: {}]   ;;  %s2287_s1 = inlined_call_operand.hbm [shape: f32[2,8,8], index: 1, kind: input, shape index: {}]   ;;  %s2288_s2 = inlined_call_operand.hbm [shape: bf16[32,96], index: 2, kind: input, shape index: {}]   ;;  %s2289_s3 = inlined_call_operand.hbm [shape: bf16[32,32], index: 3, kind: input, shape index: {}]   ;;  %s2290_s4 = inlined_call_operand.hbm [shape: f32[2,8,32], index: 4, kind: output, shape index: {0}]   ;;  %s2291_s5 = inlined_call_operand.hbm [shape: bf16[2,4,8,8], index: 5, kind: output, shape index: {1}]  }
   0x1   :  { %2293 = sst [smem:[#allocation21_spill]] %s2288_s2 }
   0x2   :  { %2294 = sst [smem:[#allocation22_spill]] %s2289_s3 }
   0x3   :  { %11 = vsyncpa [#allocation3], 0 }
   0x4   :  { %13 = vsyncpa [#allocation3 + $0x1], 0 }
   0x5   :  { %14 = vsyncpa [#allocation6], 0 }
   0x6   :  { %16 = vsyncpa [#allocation6 + $0x1], 0 }
   0x7   :  { %17 = vsyncpa [#allocation9], 0 }
   0x8   :  { %18 = vsyncpa [#allocation4], 0 }
   0x9   :  { %20 = vsyncpa [#allocation4 + $0x1], 0 }
   0xa   :  { %21 = vsyncpa [#allocation12], 0 }
   0xb   :  { %23 = vsyncpa [#allocation12 + $0x1], 0  ;;  %s1849_s18 = smov 0   ;;  %s1851_s19 = smov 0  }
   0xc   :  { %s1853_s20 = smov 0   ;;  %s1855_s21 = smov 0  }
   0xd LB: > { %2295 = sst [smem:[#allocation19_spill]] %s1797_s20  ;;  %s1873_s25 = sadd.s32 4294967295, %s1801_s21   ;;  %s1801_s21 = sphi %s1855_s21, %s2310_s21   ;;  %s1797_s20 = sphi %s1853_s20, %s2307_s20   ;;  %s1793_s19 = sphi %s1851_s19, %s2309_s19   ;;  %s1789_s18 = sphi %s1849_s18, %s2308_s18  }
   0xe   : > { %s2296_s2 = sld [smem:[#allocation21_spill]]  ;;  %p1387_p0 = scmp.ge.s32.totalorder %s1801_s21, 1 }
   0xf   : > { %p50_p1 = scmp.eq.s32.totalorder %s1873_s25, 0  ;;  %p180_p2 = scmp.lt.s32.totalorder %s1801_s21, 3 }
  0x10   : > { %s1803_s27 = smov [#allocation7]   ;;  %s2298_s3 = sld [smem:[#allocation22_spill]] }
  0x11   : > { %p1878_p3 = pnand %p1387_p0, %p180_p2  ;;  %s193_s28 = sshll.u32 %s1803_s27, 4  ;;  %s194_s28 = int_to_ptr.vmem [resolvable:$true] %s193_s28 }
  0x12   : > { %s1804_s7 = smov [#allocation8]   ;;  %s1805_s9 = smov 64  }
  0x13   : > { %p1456_p4 = pneg %p1878_p3  ;;  %s207_s8 = sshll.u32 %s1804_s7, 4  ;;  %s208_s8 = int_to_ptr.vmem [resolvable:$true] %s207_s8 }
  0x14   : > { %s191_s24 = sshll.u32 %s2296_s2, 4  ;;  %s1806_s10 = smov 4   ;;  %s192_s24 = int_to_ptr.hbm [resolvable:$true] %s191_s24 }
  0x15   : > { %p1457_p6 = pnand %p1456_p4, %p50_p1  ;;  %s1386_s11 = sadd.s32 4294967294, %s1801_s21  }
  0x16   : > { %s205_s6 = sshll.u32 %s2298_s3, 4  ;;  %s1892_s12 = sadd.s32 1, %s1801_s21   ;;  %s206_s6 = int_to_ptr.hbm [resolvable:$true] %s205_s6 }
  0x17   : > { %1459 = dma.hbm_to_vmem [thread:$0]  (!%p1457_p6), %s192_s24, 256, %s194_s28, [#allocation6], %s1805_s9, %s1805_s9, %s1806_s10  }
  0x18   : > { %1462 = dma.hbm_to_vmem [thread:$0]  (!%p1457_p6), %s206_s6, 256, %s208_s8, [#allocation9], %s1805_s9, %s1805_s9, %s1806_s10  }
  0x19   : > { %s33_s13 = ssub.s32 %s1801_s21, %s1892_s12  ;;  %s36_s14 = sadd.s32 1, %s1797_s20 }
  0x1a   : > { %p34_p7 = scmp.eq.s32.totalorder %s33_s13, 0  ;;  %p43_p8 = scmp.ne.s32.totalorder %s1797_s20, %s1793_s19 }
  0x1b   : > { %p44_p9 = scmp.eq.s32.totalorder %s1801_s21, 0  ;;  %p49_p10 = scmp.ne.s32.totalorder %s1793_s19, %s1789_s18 }
  0x1c   : > { %s1903_s15 = scalar_select %p34_p7, %s1797_s20, %s36_s14  }
  0x1d   : > { %p1905_p11 = por %p44_p9, %p43_p8  ;;  %p1911_p12 = por %p50_p1, %p49_p10 }
  0x1e   : > { %2299 = sst [smem:[#allocation20_spill]] %s1903_s15  ;;  %p141_p13 = scmp.eq.s32.totalorder %s1873_s25, 1 }
  0x1f   : > { %p147_p0 = scmp.eq.s32.totalorder %s1386_s11, 1  ;;  %p1479_p2 = scmp.lt.s32.totalorder %s1801_s21, 2 }
  0x20   : > { %s221_s22 = sand.u32 1, %s1797_s20   ;;  %p1918_p4 = por %p141_p13, %p43_p8 }
  0x21   : > { %p1922_p6 = por %p147_p0, %p49_p10  ;;  %s1926_s27 = sshll.u32 %s221_s22, 3 }
  0x22   : > { %s1392_s28 = sshll.u32 %s1801_s21, 3  ;;  %s225_s7 = scalar_lea.vmem [#allocation2], %s1926_s27 }
  0x23   : > { %s229_s6 = scalar_lea.hbm %s2286_s0, %s1392_s28  ;;  %s233_s8 = sshll.u32 %s225_s7, 4  ;;  %s234_s8 = int_to_ptr.vmem [resolvable:$true] %s233_s8 }
  0x24   : > { %s231_s9 = sshll.u32 %s229_s6, 4  ;;  %p1935_p7 = pnand %p1479_p2, %p1905_p11  ;;  %s232_s9 = int_to_ptr.hbm [resolvable:$true] %s231_s9 }
  0x25   : > { %s248_s14 = scalar_lea.hbm %s2287_s1, %s1392_s28  ;;  %s240_s2 = sand.u32 1, %s1801_s21  }
  0x26   : > { %s222_s3 = scalar_lea.sflag [#allocation3], %s221_s22  ;;  %s1631_s29 = sshra.s32 %s232_s9, 4  ;;  %s1632_s29 = int_to_ptr.hbm [resolvable:$true] %s1631_s29 }
  0x27   : > { %s1633_s30 = scalar_lea.hbm %s1632_s29, 8  ;;  %p1635_p9 = pneg %p1935_p7 }
  0x28   : > { %p1634_p8 = scmp.ne.s32.totalorder %s1632_s29, %s1633_s30  ;;  %s1638_s7 = scalar_lea.hbm %s2286_s0, 16 }
  0x29   : > { %p1639_p13 = scmp.lt.s32.totalorder %s1632_s29, %s2286_s0  ;;  %p1640_p0 = scmp.lt.s32.totalorder %s1638_s7, %s1633_s30 }
  0x2a   : > { %p1636_p10 = pnand %p1635_p9, %p1634_p8 }
  0x2b   : > { %p1641_p2 = por %p1640_p0, %p1639_p13 }
  0x2c   : > { %p1637_p11 = pneg %p1636_p10 }
  0x2e   : > { %p1642_p5 = pnand %p1641_p2, %p1637_p11 }
  0x30   : > { %1645 = shalt.err (!%p1642_p5)
}
  0x31   : > { %1466 = dma.hbm_to_vmem [thread:$0]  (!%p1935_p7), %s232_s9, 128, %s234_s8, %s222_s3  }
  0x32   : > { %s250_s22 = sshll.u32 %s248_s14, 4  ;;  %s244_s28 = scalar_lea.vmem [#allocation5], %s1926_s27  ;;  %s251_s22 = int_to_ptr.hbm [resolvable:$true] %s250_s22 }
  0x33   : > { %s252_s15 = sshll.u32 %s244_s28, 4  ;;  %s241_s16 = scalar_lea.sflag [#allocation6], %s240_s2  ;;  %s253_s15 = int_to_ptr.vmem [resolvable:$true] %s252_s15 }
  0x34   : > { %s1661_s6 = sshra.s32 %s251_s22, 4  ;;  %s1668_s7 = scalar_lea.hbm %s2287_s1, 16  ;;  %s1662_s6 = int_to_ptr.hbm [resolvable:$true] %s1661_s6 }
  0x35   : > { %s1663_s20 = scalar_lea.hbm %s1662_s6, 8  ;;  %p1669_p5 = scmp.lt.s32.totalorder %s1662_s6, %s2287_s1 }
  0x36   : > { %p1664_p8 = scmp.ne.s32.totalorder %s1662_s6, %s1663_s20  ;;  %p1670_p13 = scmp.lt.s32.totalorder %s1668_s7, %s1663_s20 }
  0x38   : > { %p1666_p10 = pnand %p1664_p8, %p1635_p9  ;;  %p1671_p0 = por %p1670_p13, %p1669_p5 }
  0x3a   : > { %p1667_p11 = pneg %p1666_p10 }
  0x3c   : > { %p1672_p2 = pnand %p1671_p0, %p1667_p11 }
  0x3e   : > { %1675 = shalt.err (!%p1672_p2)
}
  0x3f   : > { %1469 = dma.hbm_to_vmem [thread:$0]  (!%p1935_p7), %s251_s22, 128, %s253_s15, %s241_s16  }
  0x40   : > { %261 = sbr.rel (%p1878_p3) target bundleno = 1562 (0x61a), region = 36  ;;  %s1971_s2 = sand.u32 (!%p1878_p3), 1, %s1793_s19  }
  0x41   : > { %s1974_s27 = sshll.u32 (!%p1878_p3), %s1971_s2, 3  ;;  %s264_s8 = scalar_lea.sflag (!%p1878_p3), [#allocation3], %s1971_s2 }
  0x42   : > { %s267_s20 = scalar_lea.vmem (!%p1878_p3), [#allocation2], %s1974_s27 }
  0x45   : > { %1764 = dma.done.wait (%p1911_p12), %s264_s8, 128  }
  0x46   : > { %1766 = vsyncadd (%p1911_p12), %s264_s8, 4294967168  ;;  %s273_s26 = sand.u32 1, %s1873_s25   ;;  %s277_s9 = scalar_lea.vmem [#allocation5], %s1974_s27 }
  0x47   : > { %s274_s15 = scalar_lea.sflag [#allocation6], %s273_s26 }
  0x48   : > { %1768 = dma.done.wait (%p1911_p12), %s274_s15, 128  }
  0x49   : > { %1770 = vsyncadd (%p1911_p12), %s274_s15, 4294967168 }
  0x4a   : > { %1772 = dma.done.wait (%p50_p1), [#allocation6], 256  }
  0x4b   : > { %1774 = vsyncadd (%p50_p1), [#allocation6], 4294967040 }
  0x4c   : > { %1776 = dma.done.wait (%p50_p1), [#allocation9], 256  }
  0x4d   : > { %1778 = vsyncadd (%p50_p1), [#allocation9], 4294967040  ;;  %v1436_v0 = vld [vmem:[#allocation7 + $0x8] sm:$0xff]  ;;  %v1435_v1 = vld [vmem:[#allocation7] sm:$0xff]  ;;  %vm344_vm0 = vcmask 261120   ;;  %s1807_s17 = smov 104  }
  0x4e   : > { %354 = vmatpush.bf16.msra.mxu0 %v1436_v0  ;;  %v1996_v2 = vld [vmem:[%s267_s20] sm:$0xff]  ;;  %s1808_s10 = smov 120   ;;  %s1809_s14 = smov 112   ;;  %v1811_v13 = vmov 1983009808   ;;  %vm373_vm1 = vcmask 1047556  }
  0x4f   : > { %v327_v3 = vpack.c.bf16 %v1996_v2, %v1996_v2  ;;  %s1810_s13 = smov 96   ;;  %v378_v14 = vunpack.c.l.s4 %v1811_v13  ;;  %v1812_v21 = vmov 1934713408   ;;  %vm746_vm2 = vcmask 64512   ;;  %s1813_s22 = smov 64  }
  0x50   : > { %v402_v22 = vunpack.c.l.s4 %v1812_v21  ;;  %vm939_vm4 = vcmask 1043456   ;;  %s1401_s28 = sshll.u32 %s1971_s2, 4  ;;  %vm931_vm9 = vcmask 60416   ;;  %s1814_s6 = smov 16  }
  0x51   : > { %v2007_v18 = vunpack.c.0.s8 %v378_v14  ;;  %s2171_s16 = scalar_lea.vmem [#allocation11], %s1401_s28  ;;  %s1815_s29 = smov 8  }
  0x52   : > { %355 = vmatpush.bf16.msra.mxu0 %v1435_v1  ;;  %v2016_v38 = vunpack.c.0.s8 %v402_v22  ;;  %s1816_s30 = smov 24   ;;  %s1439_s7 = sshll.u32 %s1873_s25, 4 }
  0x53   : > { %s1235_s11 = sshll.u32 %s2171_s16, 4  ;;  %s1234_s20 = scalar_lea.hbm %s2291_s5, %s1439_s7  ;;  %s1236_s11 = int_to_ptr.vmem [resolvable:$true] %s1235_s11 }
  0x54   : > { %s1237_s26 = sshll.u32 %s1234_s20, 4  ;;  %s1209_s15 = scalar_lea.sflag [#allocation12], %s1971_s2  ;;  %s1238_s26 = int_to_ptr.hbm [resolvable:$true] %s1237_s26 }
  0x55   : > { %1410 = vmatmul.msk.bf16.vlgmr.msra.gmra.mxu0 %vm344_vm0, %v327_v3 }
  0xd2   : > { %v357_v4 = vpop.f32.mrf.mxu0 }
  0xd3   : > { %492 = vrot.lane.b32.xlu1 %v357_v4, %s1807_s17  ;;  %488 = vrot.lane.b32.xlu0 %v357_v4, %s1808_s10  ;;  %v361_v6 = vmul.f32 0.35355338, %v357_v4 }
  0xd5   : > { %v375_v20 = vrot.slane %v361_v6, 4 }
  0xda   : > { %v359_v5 = vpop.f32.mrf.mxu0 }
  0xdb   : > { %490 = vrot.lane.b32.xlu0 %v357_v4, %s1809_s14 }
  0xe3   : > { %366 = vrot.lane.b32.xlu0 %v361_v6, %s1809_s14 }
 0x145   : > { %v489_v7 = vpop.permute.xlu0 %488  ;;  %v493_v9 = vpop.permute.xlu1 %492 }
 0x146   : > { %v2001_v8 = vpack.i.bf16 %v489_v7, %v357_v4 }
 0x148   : > { %1532 = vrot.lane.b32.xlu1 %v2001_v8, %s1810_s13 }
 0x14d   : > { %v491_v10 = vpop.permute.xlu0 %490 }
 0x14e   : > { %v2004_v11 = vpack.i.bf16 %v493_v9, %v491_v10 }
 0x150   : > { %1537 = vrot.lane.b32.xlu2 %v2004_v11, %s1810_s13  ;;  %369 = vrot.lane.b32.xlu1 %v361_v6, %s1807_s17  ;;  %s1711_s13 = scalar_lea.hbm %s2291_s5, 32 }
 0x155   : > { %v367_v15 = vpop.permute.xlu0 %366 }
 0x156   : > { %v372_v19 = vrot.slane %v367_v15, 4  ;;  %v376_v28 = vsel %vm373_vm1, %v367_v15, %v375_v20 }
 0x157   : > { %v384_v37 = vperm.slane %v376_v28, %v2007_v18 }
 0x158   : > { %363 = vrot.lane.b32.xlu2 %v361_v6, %s1808_s10  ;;  %v374_v33 = vsel %vm373_vm1, %v372_v19, %v361_v6 }
 0x159   : > { %v380_v45 = vperm.slane %v374_v33, %v2007_v18  ;;  %v411_v56 = vrot.slane %v384_v37, 4 }
 0x15b   : > { %v399_v0 = vrot.slane %v380_v45, 4 }
 0x1aa   : > { %v1538_v12 = vpop.permute.xlu2 %1537 }
 0x1ab   : > { %v1540_v16 = vunpack.i.h.bf16 %v1538_v12  ;;  %v1539_v17 = vunpack.i.l.bf16 %v1538_v12 }
 0x1ad   : > { %v518_v24 = vrot.slane %v1540_v16, 4  ;;  %v506_v25 = vrot.slane %v1539_v17, 4 }
 0x1b2   : > { %v364_v34 = vpop.permute.xlu2 %363 }
 0x1b3   : > { %v387_v46 = vrot.slane %v364_v34, 4 }
 0x1ba   : > { %v1533_v23 = vpop.permute.xlu1 %1532 }
 0x1bb   : > { %v1535_v26 = vunpack.i.h.bf16 %v1533_v23  ;;  %v1534_v27 = vunpack.i.l.bf16 %v1533_v23 }
 0x1bd   : > { %v520_v29 = vrot.slane %v1535_v26, 4  ;;  %v507_v30 = vsel %vm373_vm1, %v506_v25, %v1534_v27  ;;  %v508_v31 = vrot.slane %v1534_v27, 4  ;;  %v519_v32 = vsel %vm373_vm1, %v518_v24, %v1535_v26 }
 0x1be   : > { %v513_v35 = vperm.slane %v507_v30, %v2007_v18  ;;  %v525_v36 = vperm.slane %v519_v32, %v2007_v18 }
 0x1bf   : > { %v509_v39 = vsel %vm373_vm1, %v1539_v17, %v508_v31  ;;  %v521_v40 = vsel %vm373_vm1, %v1540_v16, %v520_v29 }
 0x1c0   : > { %v517_v41 = vperm.slane %v509_v39, %v2007_v18  ;;  %v529_v42 = vperm.slane %v521_v40, %v2007_v18  ;;  %v530_v43 = vrot.slane %v525_v36, 4  ;;  %v532_v44 = vrot.slane %v513_v35, 4 }
 0x1c2   : > { %v531_v47 = vsel %vm373_vm1, %v530_v43, %v513_v35  ;;  %v533_v48 = vsel %vm373_vm1, %v525_v36, %v532_v44  ;;  %v542_v49 = vrot.slane %v529_v42, 4  ;;  %v544_v50 = vrot.slane %v517_v41, 4  ;;  %v370_v51 = vpop.permute.xlu1 %369 }
 0x1c3   : > { %v537_v52 = vperm.slane %v531_v47, %v2016_v38  ;;  %v541_v53 = vperm.slane %v533_v48, %v2016_v38  ;;  %v385_v54 = vrot.slane %v370_v51, 4  ;;  %v388_v55 = vsel %vm373_vm1, %v370_v51, %v387_v46 }
 0x1c4   : > { %v543_v57 = vsel %vm373_vm1, %v542_v49, %v517_v41  ;;  %v545_v58 = vsel %vm373_vm1, %v529_v42, %v544_v50  ;;  %v396_v59 = vperm.slane %v388_v55, %v2007_v18 }
 0x1c5   : > { %v549_v60 = vperm.slane %v543_v57, %v2016_v38  ;;  %v553_v61 = vperm.slane %v545_v58, %v2016_v38  ;;  %v554_v62 = vrot.slane %v537_v52, 4  ;;  %v556_v63 = vrot.slane %v541_v53, 4 }
 0x1c6   : > { %v386_v1 = vsel %vm373_vm1, %v385_v54, %v364_v34  ;;  %v409_v3 = vrot.slane %v396_v59, 4  ;;  %v412_v4 = vsel %vm373_vm1, %v396_v59, %v411_v56 }
 0x1c7   : > { %v555_v5 = vsel %vm373_vm1, 0.0, %v554_v62  ;;  %v557_v6 = vsel %vm373_vm1, 0.0, %v556_v63  ;;  %v558_v7 = vrot.slane %v549_v60, 4  ;;  %v560_v9 = vrot.slane %v553_v61, 4 }
 0x1c8   : > { %v562_v10 = vsel %vm373_vm1, %v556_v63, %v537_v52  ;;  %v567_v12 = vrot.slane %v557_v6, 4  ;;  %v392_v13 = vperm.slane %v386_v1, %v2007_v18  ;;  %v410_v14 = vsel %vm373_vm1, %v409_v3, %v384_v37 }
 0x1c9   : > { %v561_v15 = vsel %vm373_vm1, 0.0, %v560_v9  ;;  %v416_v16 = vperm.slane %v410_v14, %v2016_v38  ;;  %v420_v17 = vperm.slane %v412_v4, %v2016_v38  ;;  %v559_v19 = vsel %vm373_vm1, 0.0, %v558_v7 }
 0x1ca   : > { %v578_v20 = vrot.slane %v561_v15, 4  ;;  %v397_v21 = vrot.slane %v392_v13, 4  ;;  %v400_v22 = vsel %vm373_vm1, %v392_v13, %v399_v0  ;;  %v566_v23 = vperm.slane %v562_v10, %v2007_v18 }
 0x1cb   : > { %v408_v24 = vperm.slane %v400_v22, %v2016_v38  ;;  %v425_v25 = vrot.slane %v416_v16, 4  ;;  %v427_v26 = vrot.slane %v420_v17, 4  ;;  %v568_v27 = vsel %vm373_vm1, %v567_v12, %v555_v5 }
 0x1cc   : > { %v398_v28 = vsel %vm373_vm1, %v397_v21, %v380_v45  ;;  %v572_v29 = vperm.slane %v568_v27, %v2007_v18  ;;  %v573_v30 = vsel %vm373_vm1, %v560_v9, %v549_v60  ;;  %v579_v31 = vsel %vm373_vm1, %v578_v20, %v559_v19 }
 0x1cd   : > { %v404_v32 = vperm.slane %v398_v28, %v2016_v38  ;;  %v423_v33 = vrot.slane %v408_v24, 4  ;;  %v426_v34 = vsel %vm373_vm1, 0.0, %v425_v25  ;;  %v428_v35 = vsel %vm373_vm1, 0.0, %v427_v26 }
 0x1ce   : > { %v440_v36 = vsel %vm373_vm1, %v427_v26, %v416_v16  ;;  %v445_v37 = vrot.slane %v428_v35, 4  ;;  %v577_v39 = vperm.slane %v573_v30, %v2007_v18  ;;  %v583_v40 = vperm.slane %v579_v31, %v2007_v18 }
 0x1cf   : > { %v421_v41 = vrot.slane %v404_v32, 4  ;;  %v424_v42 = vsel %vm373_vm1, 0.0, %v423_v33  ;;  %v429_v43 = vsel %vm373_vm1, %v423_v33, %v404_v32  ;;  %v444_v44 = vperm.slane %v440_v36, %v2007_v18 }
 0x1d0   : > { %v433_v45 = vperm.slane %v429_v43, %v2007_v18  ;;  %v434_v46 = vrot.slane %v424_v42, 4  ;;  %v446_v47 = vsel %vm373_vm1, %v445_v37, %v426_v34  ;;  %v586_v48 = vrot.slane %v566_v23, 4 }
 0x1d1   : > { %v422_v49 = vsel %vm373_vm1, 0.0, %v421_v41  ;;  %v450_v50 = vperm.slane %v446_v47, %v2007_v18  ;;  %v465_v51 = vrot.slane %v444_v44, 4  ;;  %v598_v52 = vrot.slane %v577_v39, 4 }
 0x1d2   : > { %v435_v53 = vsel %vm373_vm1, %v434_v46, %v422_v49  ;;  %v587_v54 = vsel %vm373_vm1, %v572_v29, %v586_v48  ;;  %v584_v55 = vrot.slane %v572_v29, 4  ;;  %v596_v56 = vrot.slane %v583_v40, 4 }
 0x1d3   : > { %v595_v57 = vperm.slane %v587_v54, %v2016_v38  ;;  %v599_v58 = vsel %vm373_vm1, %v583_v40, %v598_v52  ;;  %v439_v59 = vperm.slane %v435_v53, %v2007_v18  ;;  %v453_v60 = vrot.slane %v433_v45, 4 }
 0x1d4   : > { %v607_v61 = vperm.slane %v599_v58, %v2016_v38  ;;  %v585_v62 = vsel %vm373_vm1, %v584_v55, %v566_v23  ;;  %v597_v63 = vsel %vm373_vm1, %v596_v56, %v577_v39  ;;  %v466_v0 = vsel %vm373_vm1, %v450_v50, %v465_v51 }
 0x1d5   : > { %v614_v1 = vrot.slane %v595_v57, 4  ;;  %v591_v3 = vperm.slane %v585_v62, %v2016_v38  ;;  %v603_v4 = vperm.slane %v597_v63, %v2016_v38  ;;  %v454_v5 = vsel %vm373_vm1, %v439_v59, %v453_v60 }
 0x1d6   : > { %v612_v6 = vrot.slane %v607_v61, 4  ;;  %v462_v7 = vperm.slane %v454_v5, %v2016_v38  ;;  %v474_v9 = vperm.slane %v466_v0, %v2016_v38  ;;  %v451_v10 = vrot.slane %v439_v59, 4 }
 0x1d7   : > { %v615_v12 = vsel %vm373_vm1, %v607_v61, %v614_v1  ;;  %v610_v13 = vrot.slane %v591_v3, 4  ;;  %v608_v14 = vrot.slane %v603_v4, 4  ;;  %v463_v15 = vrot.slane %v450_v50, 4 }
 0x1d8   : > { %v619_v16 = vpack.c.bf16 %v615_v12, %v615_v12  ;;  %v613_v17 = vsel %vm373_vm1, %v612_v6, %v595_v57  ;;  %v481_v19 = vrot.slane %v462_v7, 4  ;;  %v452_v20 = vsel %vm373_vm1, %v451_v10, %v433_v45  ;;  %v823_v45 = vld [vmem:[%s277_s9] sm:$0xff]  ;;  %s1705_s9 = sshra.s32 %s1238_s26, 4  ;;  %s1706_s9 = int_to_ptr.hbm [resolvable:$true] %s1705_s9 }
 0x1d9   : > { %v611_v21 = vsel %vm373_vm1, %v603_v4, %v610_v13  ;;  %v618_v22 = vpack.c.bf16 %v613_v17, %v613_v17  ;;  %v609_v23 = vsel %vm373_vm1, %v608_v14, %v591_v3  ;;  %v458_v24 = vperm.slane %v452_v20, %v2016_v38  ;;  %s1707_s17 = scalar_lea.hbm %s1706_s9, 16  ;;  %p1712_p7 = scmp.lt.s32.totalorder %s1706_s9, %s2291_s5 }
 0x1da   : > { %v808_v25 = vsel %vm746_vm2, %v619_v16, 0  ;;  %v617_v26 = vpack.c.bf16 %v611_v21, %v611_v21  ;;  %v616_v27 = vpack.c.bf16 %v609_v23, %v609_v23  ;;  %v464_v29 = vsel %vm373_vm1, %v463_v15, %v444_v44  ;;  %p1708_p1 = scmp.ne.s32.totalorder %s1706_s9, %s1707_s17  ;;  %p1713_p9 = scmp.lt.s32.totalorder %s1711_s13, %s1707_s17 }
 0x1db   : > { %817 = vmatpush.bf16.xpose.msrb.mxu0 %v808_v25  ;;  %v789_v28 = vsel %vm746_vm2, %v618_v22, 0  ;;  %v477_v30 = vrot.slane %v458_v24, 4  ;;  %v470_v33 = vperm.slane %v464_v29, %v2016_v38  ;;  %v479_v34 = vrot.slane %v474_v9, 4 }
 0x1dc   : > { %v770_v31 = vsel %vm746_vm2, %v617_v26, 0  ;;  %798 = vmatpush.bf16.xpose.msra.mxu3 %v789_v28  ;;  %v751_v32 = vsel %vm746_vm2, %v616_v27, 0  ;;  %v482_v35 = vsel %vm373_vm1, %v474_v9, %v481_v19  ;;  %vm824_vm3 = vcmp.gt.f32.partialorder %v823_v45, 0.0  ;;  %p1709_p3 = pnand %p1708_p1, %p1918_p4  ;;  %p1714_p8 = por %p1713_p9, %p1712_p7 }
 0x1dd   : > { %779 = vmatpush.bf16.xpose.msra.mxu2 %v770_v31  ;;  %760 = vmatpush.bf16.xpose.msra.mxu1 %v751_v32  ;;  %v480_v36 = vsel %vm373_vm1, %v479_v34, %v462_v7  ;;  %v475_v37 = vrot.slane %v470_v33, 4  ;;  %v478_v39 = vsel %vm373_vm1, %v470_v33, %v477_v30  ;;  %v486_v40 = vpack.c.bf16 %v482_v35, %v482_v35 }
 0x1de   : > { %v485_v42 = vpack.c.bf16 %v480_v36, %v480_v36  ;;  %v484_v43 = vpack.c.bf16 %v478_v39, %v478_v39  ;;  %p1710_p12 = pneg %p1709_p3 }
 0x1df   : > { %v476_v41 = vsel %vm373_vm1, %v475_v37, %v458_v24 }
 0x1e0   : > { %v483_v44 = vpack.c.bf16 %v476_v41, %v476_v41  ;;  %p1715_p10 = pnand %p1714_p8, %p1710_p12 }
 0x1e2   : > { %1414 = vmatmul.msk.bf16.vlgmr.msrb.gmra.mxu0 %vm746_vm2, %v486_v40 }
 0x1e3   : > { %1413 = vmatmul.msk.bf16.vlgmr.msra.gmra.mxu3 %vm746_vm2, %v485_v42 }
 0x1e4   : > { %1412 = vmatmul.msk.bf16.vlgmr.msra.gmra.mxu2 %vm746_vm2, %v484_v43  ;;  %1411 = vmatmul.msk.bf16.vlgmr.msra.gmra.mxu1 %vm746_vm2, %v483_v44 }
 0x25f   : > { %v819_v46 = vpop.f32.mrf.mxu0 }
 0x260   : > { %v830_v58 = vsel %vm824_vm3, -1e+09, %v819_v46 }
 0x261   : > { %v762_v47 = vpop.f32.mrf.mxu1  ;;  %v840_v61 = vsel %vm746_vm2, %v830_v58, -inf }
 0x262   : > { %v827_v48 = vsel %vm824_vm3, -1e+09, %v762_v47 }
 0x263   : > { %v831_v49 = vsel %vm746_vm2, %v827_v48, -inf }
 0x264   : > { %832 = vmax.xlane.f32.xlu1 %v831_v49 }
 0x266   : > { %v800_v50 = vpop.f32.mrf.mxu3 }
 0x267   : > { %v781_v51 = vpop.f32.mrf.mxu2  ;;  %v829_v52 = vsel %vm824_vm3, -1e+09, %v800_v50  ;;  %v821_v53 = vpop.f32.mrf.mxu0 }
 0x268   : > { %v828_v54 = vsel %vm824_vm3, -1e+09, %v781_v51  ;;  %v837_v55 = vsel %vm746_vm2, %v829_v52, -inf }
 0x269   : > { %838 = vmax.xlane.f32.xlu2 %v837_v55  ;;  %v834_v56 = vsel %vm746_vm2, %v828_v54, -inf  ;;  %v764_v57 = vpop.f32.mrf.mxu1 }
 0x26a   : > { %835 = vmax.xlane.f32.xlu0 %v834_v56 }
 0x26e   : > { %v802_v59 = vpop.f32.mrf.mxu3 }
 0x26f   : > { %v783_v60 = vpop.f32.mrf.mxu2 }
 0x271   : > { %841 = vmax.xlane.f32.xlu2 %v840_v61 }
 0x27e   : > { %1547 = vrot.lane.b32.xlu0 %v2004_v11, %s1813_s22 }
 0x289   : > { %1542 = vrot.lane.b32.xlu2 %v2001_v8, %s1813_s22 }
 0x2d7   : > { %v833_v4 = vpop.xlane.xlu1 %832 }
 0x2d8   : > { %v843_v9 = vsub.f32 %v827_v48, %v833_v4 }
 0x2da   : > { %v847_v8 = vmul.f32 1.442695, %v843_v9 }
 0x2dc   : > { %v839_v62 = vpop.xlane.xlu2 %838 }
 0x2dd   : > { %v845_v63 = vsub.f32 %v829_v52, %v839_v62  ;;  %v836_v0 = vpop.xlane.xlu0 %835 }
 0x2de   : > { %v844_v3 = vsub.f32 %v828_v54, %v836_v0 }
 0x2df   : > { %v851_v1 = vmul.f32 1.442695, %v845_v63 }
 0x2e0   : > { %v849_v5 = vmul.f32 1.442695, %v844_v3 }
 0x2e1   : > { %1551 = vpow2.f32 %v851_v1 }
 0x2e2   : > { %1553 = vpow2.f32 %v849_v5 }
 0x2e4   : > { %v842_v6 = vpop.xlane.xlu2 %841 }
 0x2e5   : > { %v846_v7 = vsub.f32 %v830_v58, %v842_v6 }
 0x2e7   : > { %v2109_v10 = vpop.eup %1551  ;;  %v853_v12 = vmul.f32 1.442695, %v846_v7 }
 0x2e8   : > { %v861_v11 = vsel %vm746_vm2, %v2109_v10, 0.0  ;;  %v2113_v14 = vpop.eup %1553 }
 0x2e9   : > { %1555 = vpow2.f32 %v853_v12  ;;  %862 = vadd.xlane.f32.xlu1 %v861_v11  ;;  %v858_v22 = vsel %vm746_vm2, %v2113_v14, 0.0 }
 0x2ea   : > { %1557 = vpow2.f32 %v847_v8 }
 0x2ec   : > { %v1543_v13 = vpop.permute.xlu2 %1542 }
 0x2ed   : > { %v1545_v15 = vunpack.i.h.bf16 %v1543_v13  ;;  %v1544_v16 = vunpack.i.l.bf16 %v1543_v13 }
 0x2ef   : > { %v2115_v17 = vpop.eup %1555  ;;  %v646_v19 = vrot.slane %v1545_v15, 4  ;;  %v634_v20 = vrot.slane %v1544_v16, 4 }
 0x2f0   : > { %v1548_v21 = vpop.permute.xlu0 %1547  ;;  %v864_v23 = vsel %vm746_vm2, %v2115_v17, 0.0  ;;  %v2123_v30 = vpop.eup %1557 }
 0x2f1   : > { %v1550_v24 = vunpack.i.h.bf16 %v1548_v21  ;;  %v1549_v25 = vunpack.i.l.bf16 %v1548_v21  ;;  %859 = vadd.xlane.f32.xlu1 %v858_v22  ;;  %865 = vadd.xlane.f32.xlu0 %v864_v23  ;;  %v855_v40 = vsel %vm746_vm2, %v2123_v30, 0.0 }
 0x2f3   : > { %v644_v26 = vrot.slane %v1550_v24, 4  ;;  %v632_v27 = vrot.slane %v1549_v25, 4  ;;  %v635_v28 = vsel %vm373_vm1, %v1549_v25, %v634_v20  ;;  %v647_v29 = vsel %vm373_vm1, %v1550_v24, %v646_v19 }
 0x2f4   : > { %v643_v31 = vperm.slane %v635_v28, %v2007_v18  ;;  %v655_v32 = vperm.slane %v647_v29, %v2007_v18 }
 0x2f5   : > { %v633_v33 = vsel %vm373_vm1, %v632_v27, %v1544_v16  ;;  %v645_v34 = vsel %vm373_vm1, %v644_v26, %v1545_v15 }
 0x2f6   : > { %v639_v35 = vperm.slane %v633_v33, %v2007_v18  ;;  %v651_v36 = vperm.slane %v645_v34, %v2007_v18  ;;  %v668_v37 = vrot.slane %v655_v32, 4  ;;  %v670_v39 = vrot.slane %v643_v31, 4 }
 0x2f8   : > { %v656_v41 = vrot.slane %v651_v36, 4  ;;  %v658_v42 = vrot.slane %v639_v35, 4  ;;  %v669_v43 = vsel %vm373_vm1, %v668_v37, %v643_v31  ;;  %v671_v44 = vsel %vm373_vm1, %v655_v32, %v670_v39 }
 0x2f9   : > { %v675_v45 = vperm.slane %v669_v43, %v2016_v38  ;;  %v679_v46 = vperm.slane %v671_v44, %v2016_v38  ;;  %856 = vadd.xlane.f32.xlu1 %v855_v40 }
 0x2fa   : > { %v657_v47 = vsel %vm373_vm1, %v656_v41, %v639_v35  ;;  %v659_v48 = vsel %vm373_vm1, %v651_v36, %v658_v42 }
 0x2fb   : > { %v663_v49 = vperm.slane %v657_v47, %v2016_v38  ;;  %v667_v50 = vperm.slane %v659_v48, %v2016_v38  ;;  %v684_v51 = vrot.slane %v675_v45, 4  ;;  %v686_v52 = vrot.slane %v679_v46, 4 }
 0x2fd   : > { %v680_v53 = vrot.slane %v663_v49, 4  ;;  %v682_v54 = vrot.slane %v667_v50, 4  ;;  %v687_v55 = vsel %vm373_vm1, 0.0, %v686_v52  ;;  %v699_v56 = vsel %vm373_vm1, %v686_v52, %v675_v45 }
 0x2fe   : > { %v704_v57 = vrot.slane %v687_v55, 4  ;;  %v685_v59 = vsel %vm373_vm1, 0.0, %v684_v51  ;;  %v703_v61 = vperm.slane %v699_v56, %v2007_v18 }
 0x2ff   : > { %v683_v58 = vsel %vm373_vm1, 0.0, %v682_v54  ;;  %v688_v60 = vsel %vm373_vm1, %v682_v54, %v663_v49  ;;  %v681_v1 = vsel %vm373_vm1, 0.0, %v680_v53 }
 0x300   : > { %v693_v62 = vrot.slane %v683_v58, 4  ;;  %v692_v63 = vperm.slane %v688_v60, %v2007_v18  ;;  %v705_v0 = vsel %vm373_vm1, %v704_v57, %v685_v59  ;;  %v724_v4 = vrot.slane %v703_v61, 4 }
 0x301   : > { %v709_v3 = vperm.slane %v705_v0, %v2007_v18 }
 0x302   : > { %v694_v5 = vsel %vm373_vm1, %v693_v62, %v681_v1  ;;  %v712_v6 = vrot.slane %v692_v63, 4 }
 0x303   : > { %v698_v7 = vperm.slane %v694_v5, %v2007_v18  ;;  %v725_v9 = vsel %vm373_vm1, %v709_v3, %v724_v4  ;;  %v722_v12 = vrot.slane %v709_v3, 4 }
 0x304   : > { %v733_v11 = vperm.slane %v725_v9, %v2016_v38 }
 0x305   : > { %v713_v8 = vsel %vm373_vm1, %v698_v7, %v712_v6  ;;  %v710_v13 = vrot.slane %v698_v7, 4  ;;  %v723_v15 = vsel %vm373_vm1, %v722_v12, %v703_v61 }
 0x306   : > { %v721_v16 = vperm.slane %v713_v8, %v2016_v38  ;;  %v738_v19 = vrot.slane %v733_v11, 4  ;;  %v729_v20 = vperm.slane %v723_v15, %v2016_v38 }
 0x307   : > { %v711_v21 = vsel %vm373_vm1, %v710_v13, %v692_v63 }
 0x308   : > { %v739_v22 = vsel %vm373_vm1, %v738_v19, %v721_v16  ;;  %v740_v23 = vrot.slane %v721_v16, 4  ;;  %v717_v24 = vperm.slane %v711_v21, %v2016_v38  ;;  %v734_v25 = vrot.slane %v729_v20, 4 }
 0x309   : > { %v744_v26 = vpack.c.bf16 %v739_v22, %v739_v22 }
 0x30a   : > { %v735_v27 = vsel %vm373_vm1, %v734_v25, %v717_v24  ;;  %v741_v28 = vsel %vm373_vm1, %v733_v11, %v740_v23  ;;  %v736_v29 = vrot.slane %v717_v24, 4 }
 0x30b   : > { %v979_v31 = vsel %vm939_vm4, %v744_v26, 0  ;;  %v742_v32 = vpack.c.bf16 %v735_v27, %v735_v27  ;;  %v745_v33 = vpack.c.bf16 %v741_v28, %v741_v28 }
 0x30c   : > { %988 = vmatpush.bf16.msrb.mxu3 %v979_v31  ;;  %v737_v34 = vsel %vm373_vm1, %v729_v20, %v736_v29 }
 0x30d   : > { %v941_v35 = vsel %vm939_vm4, %v742_v32, 0  ;;  %v998_v36 = vsel %vm939_vm4, %v745_v33, 0  ;;  %v743_v37 = vpack.c.bf16 %v737_v34, %v737_v34 }
 0x30e   : > { %950 = vmatpush.bf16.msrb.mxu1 %v941_v35  ;;  %1007 = vmatpush.bf16.msra.mxu0 %v998_v36 }
 0x30f   : > { %v960_v39 = vsel %vm939_vm4, %v743_v37, 0 }
 0x310   : > { %969 = vmatpush.bf16.msrb.mxu2 %v960_v39 }
 0x35c   : > { %v863_v40 = vpop.xlane.xlu1 %862 }
 0x35d   : > { %1559 = vrcp.f32 %v863_v40  ;;  %v908_v47 = vand.u32 2147483648, %v863_v40  ;;  %v906_v48 = vand.u32 2147483647, %v863_v40  ;;  %vm902_vm6 = vweird.f32 %v863_v40 }
 0x35f   : > { %v909_v52 = vor.u32 1.1754944e-38, %v908_v47  ;;  %vm907_vm8 = vcmp.eq.f32.partialorder %v906_v48, 8.507059e+37 }
 0x363   : > { %v1560_v41 = vpop.eup %1559 }
 0x364   : > { %v898_v42 = vmul.f32 %v1560_v41, %v863_v40  ;;  %v860_v43 = vpop.xlane.xlu1 %859  ;;  %v866_v44 = vpop.xlane.xlu0 %865  ;;  %vm903_vm5 = vweird.f32 %v1560_v41 }
 0x365   : > { %1561 = vrcp.f32 %v860_v43  ;;  %vm904_vm7 = vmor %vm902_vm6, %vm903_vm5  ;;  %v893_v59 = vand.u32 2147483648, %v860_v43  ;;  %v891_v63 = vand.u32 2147483647, %v860_v43  ;;  %v923_v0 = vand.u32 2147483648, %v866_v44 }
 0x366   : > { %v899_v45 = vsub.f32 1.0, %v898_v42  ;;  %1563 = vrcp.f32 %v866_v44  ;;  %v921_v3 = vand.u32 2147483647, %v866_v44  ;;  %vm887_vm12 = vweird.f32 %v860_v43 }
 0x367   : > { %v894_v7 = vor.u32 1.1754944e-38, %v893_v59  ;;  %vm917_vm14 = vweird.f32 %v866_v44  ;;  %vm892_vm15 = vcmp.eq.f32.partialorder %v891_v63, 8.507059e+37 }
 0x368   : > { %v900_v46 = vmul.f32 %v1560_v41, %v899_v45  ;;  %vm922_vm4 = vcmp.eq.f32.partialorder %v921_v3, 8.507059e+37 }
 0x36a   : > { %v901_v49 = vadd.f32 %v1560_v41, %v900_v46 }
 0x36b   : > { %v1562_v50 = vpop.eup %1561 }
 0x36c   : > { %v1564_v51 = vpop.eup %1563  ;;  %v883_v53 = vmul.f32 %v1562_v50, %v860_v43  ;;  %v857_v54 = vpop.xlane.xlu1 %856  ;;  %v905_v55 = vsel %vm904_vm7, %v1560_v41, %v901_v49  ;;  %vm888_vm10 = vweird.f32 %v1562_v50 }
 0x36d   : > { %v913_v56 = vmul.f32 %v1564_v51, %v866_v44  ;;  %1565 = vrcp.f32 %v857_v54  ;;  %v910_v58 = vsel %vm907_vm8, %v909_v52, %v905_v55  ;;  %vm918_vm11 = vweird.f32 %v1564_v51  ;;  %vm889_vm13 = vmor %vm887_vm12, %vm888_vm10 }
 0x36e   : > { %v884_v57 = vsub.f32 1.0, %v883_v53  ;;  %v911_v61 = vmul.f32 %v2109_v10, %v910_v58  ;;  %vm919_vm3 = vmor %vm917_vm14, %vm918_vm11  ;;  %v924_v10 = vor.u32 1.1754944e-38, %v923_v0  ;;  %v878_v21 = vand.u32 2147483648, %v857_v54 }
 0x36f   : > { %v914_v60 = vsub.f32 1.0, %v913_v56  ;;  %v876_v23 = vand.u32 2147483647, %v857_v54  ;;  %vm872_vm6 = vweird.f32 %v857_v54  ;;  %vm1138_vm10 = vcmask 195584  }
 0x370   : > { %v885_v62 = vmul.f32 %v1562_v50, %v884_v57  ;;  %v929_v4 = vpack.c.bf16 %v911_v61, %v911_v61  ;;  %v879_v27 = vor.u32 1.1754944e-38, %v878_v21 }
 0x371   : > { %v915_v1 = vmul.f32 %v1564_v51, %v914_v60  ;;  %vm877_vm8 = vcmp.eq.f32.partialorder %v876_v23, 8.507059e+37 }
 0x372   : > { %v886_v5 = vadd.f32 %v1562_v50, %v885_v62  ;;  %934 = vst.msk [vmem:[%s2171_s16 + $0x8] sm:$0xf] %vm931_vm9, %v929_v4  ;;  %1417 = vmatmul.msk.bf16.vlgmr.msrb.gmra.mxu3 %vm746_vm2, %v929_v4 }
 0x373   : > { %v1566_v6 = vpop.eup %1565  ;;  %v916_v9 = vadd.f32 %v1564_v51, %v915_v1 }
 0x374   : > { %v868_v12 = vmul.f32 %v1566_v6, %v857_v54  ;;  %v890_v11 = vsel %vm889_vm13, %v1562_v50, %v886_v5  ;;  %vm873_vm5 = vweird.f32 %v1566_v6 }
 0x375   : > { %v920_v8 = vsel %vm919_vm3, %v1564_v51, %v916_v9  ;;  %v895_v13 = vsel %vm892_vm15, %v894_v7, %v890_v11  ;;  %vm874_vm7 = vmor %vm872_vm6, %vm873_vm5 }
 0x376   : > { %v925_v15 = vsel %vm922_vm4, %v924_v10, %v920_v8  ;;  %v869_v16 = vsub.f32 1.0, %v868_v12  ;;  %v896_v19 = vmul.f32 %v2113_v14, %v895_v13 }
 0x377   : > { %v926_v20 = vmul.f32 %v2115_v17, %v925_v15 }
 0x378   : > { %v870_v22 = vmul.f32 %v1566_v6, %v869_v16  ;;  %v928_v24 = vpack.c.bf16 %v896_v19, %v896_v19 }
 0x379   : > { %v930_v25 = vpack.c.bf16 %v926_v20, %v926_v20 }
 0x37a   : > { %v871_v26 = vadd.f32 %v1566_v6, %v870_v22  ;;  %933 = vst.msk [vmem:[%s2171_s16 + $0x4] sm:$0xf] %vm931_vm9, %v928_v24  ;;  %1416 = vmatmul.msk.bf16.vlgmr.msrb.gmra.mxu2 %vm746_vm2, %v928_v24 }
 0x37b   : > { %935 = vst.msk [vmem:[%s2171_s16 + $0xc] sm:$0xf] %vm931_vm9, %v930_v25  ;;  %1418 = vmatmul.msk.bf16.vlgmr.msra.gmra.mxu0 %vm746_vm2, %v930_v25 }
 0x37c   : > { %v875_v14 = vsel %vm874_vm7, %v1566_v6, %v871_v26 }
 0x37d   : > { %v880_v17 = vsel %vm877_vm8, %v879_v27, %v875_v14 }
 0x37e   : > { %v881_v28 = vmul.f32 %v2123_v30, %v880_v17 }
 0x380   : > { %v927_v29 = vpack.c.bf16 %v881_v28, %v881_v28 }
 0x382   : > { %932 = vst.msk [vmem:[%s2171_s16] sm:$0xf] %vm931_vm9, %v927_v29  ;;  %1415 = vmatmul.msk.bf16.vlgmr.msrb.gmra.mxu1 %vm746_vm2, %v927_v29  ;;  %vm1136_vm9 = vcmask 130048  }
 0x3f5   : > { %v990_v31 = vpop.f32.mrf.mxu3 }
 0x3f6   : > { %v1013_v35 = vrot.slane %v990_v31, 4 }
 0x3f8   : > { %v1009_v32 = vpop.f32.mrf.mxu0 }
 0x3f9   : > { %v1025_v33 = vrot.slane %v1009_v32, 4 }
 0x3fd   : > { %v971_v34 = vpop.f32.mrf.mxu2  ;;  %v992_v39 = vpop.f32.mrf.mxu3 }
 0x3fe   : > { %v1026_v36 = vsel %vm373_vm1, %v1025_v33, %v971_v34  ;;  %v1027_v37 = vrot.slane %v971_v34, 4 }
 0x3ff   : > { %v1032_v40 = vperm.slane %v1026_v36, %v2007_v18  ;;  %v952_v41 = vpop.f32.mrf.mxu1 }
 0x400   : > { %v1028_v42 = vsel %vm373_vm1, %v1009_v32, %v1027_v37  ;;  %v1014_v30 = vsel %vm373_vm1, %v1013_v35, %v952_v41  ;;  %v1015_v43 = vrot.slane %v952_v41, 4  ;;  %v1011_v44 = vpop.f32.mrf.mxu0 }
 0x401   : > { %v1036_v45 = vperm.slane %v1028_v42, %v2007_v18  ;;  %v1037_v46 = vrot.slane %v1032_v40, 4  ;;  %v1020_v47 = vperm.slane %v1014_v30, %v2007_v18 }
 0x402   : > { %v1016_v48 = vsel %vm373_vm1, %v990_v31, %v1015_v43 }
 0x403   : > { %v1049_v49 = vrot.slane %v1036_v45, 4  ;;  %v1024_v50 = vperm.slane %v1016_v48, %v2007_v18  ;;  %v1038_v51 = vsel %vm373_vm1, %v1037_v46, %v1020_v47  ;;  %v1039_v52 = vrot.slane %v1020_v47, 4 }
 0x404   : > { %v1044_v53 = vperm.slane %v1038_v51, %v2016_v38  ;;  %v1817_v51 = vmov 32.0  }
 0x405   : > { %v1040_v54 = vsel %vm373_vm1, %v1032_v40, %v1039_v52  ;;  %v1050_v55 = vsel %vm373_vm1, %v1049_v49, %v1024_v50  ;;  %v1051_v56 = vrot.slane %v1024_v50, 4  ;;  %v973_v57 = vpop.f32.mrf.mxu2  ;;  %v1438_v40 = vld [vmem:[#allocation8 + $0x8] sm:$0xff]  ;;  %1567 = vrcp.f32 %v1817_v51 }
 0x406   : > { %v1048_v58 = vperm.slane %v1040_v54, %v2016_v38  ;;  %v1056_v59 = vperm.slane %v1050_v55, %v2016_v38  ;;  %v1061_v63 = vrot.slane %v1044_v53, 4  ;;  %1166 = vmatpush.bf16.msra.mxu1 %v1438_v40 }
 0x407   : > { %v1052_v60 = vsel %vm373_vm1, %v1036_v45, %v1051_v56  ;;  %v954_v61 = vpop.f32.mrf.mxu1 }
 0x408   : > { %v1060_v62 = vperm.slane %v1052_v60, %v2016_v38  ;;  %v1063_v0 = vrot.slane %v1048_v58, 4  ;;  %v1065_v3 = vrot.slane %v1056_v59, 4  ;;  %v1062_v9 = vsel %vm373_vm1, 0.0, %v1061_v63 }
 0x40a   : > { %v1064_v1 = vsel %vm373_vm1, 0.0, %v1063_v0  ;;  %v1067_v4 = vrot.slane %v1060_v62, 4  ;;  %v1069_v5 = vsel %vm373_vm1, %v1063_v0, %v1044_v53  ;;  %v1066_v15 = vsel %vm373_vm1, 0.0, %v1065_v3 }
 0x40b   : > { %v1074_v6 = vrot.slane %v1064_v1, 4  ;;  %v1073_v7 = vperm.slane %v1069_v5, %v2007_v18  ;;  %v1568_v52 = vpop.eup %1567 }
 0x40c   : > { %v1068_v10 = vsel %vm373_vm1, 0.0, %v1067_v4  ;;  %v1080_v12 = vsel %vm373_vm1, %v1067_v4, %v1056_v59  ;;  %v1177_v53 = vmul.f32 32.0, %v1568_v52 }
 0x40d   : > { %v1085_v11 = vrot.slane %v1068_v10, 4  ;;  %v1075_v8 = vsel %vm373_vm1, %v1074_v6, %v1062_v9  ;;  %v1084_v13 = vperm.slane %v1080_v12, %v2007_v18  ;;  %v1093_v19 = vrot.slane %v1073_v7, 4 }
 0x40e   : > { %v1079_v16 = vperm.slane %v1075_v8, %v2007_v18  ;;  %v1178_v54 = vsub.f32 1.0, %v1177_v53 }
 0x40f   : > { %v1086_v20 = vsel %vm373_vm1, %v1085_v11, %v1066_v15  ;;  %v1105_v21 = vrot.slane %v1084_v13, 4 }
 0x410   : > { %v1090_v22 = vperm.slane %v1086_v20, %v2007_v18  ;;  %v1091_v23 = vrot.slane %v1079_v16, 4  ;;  %v1094_v24 = vsel %vm373_vm1, %v1079_v16, %v1093_v19  ;;  %v1179_v55 = vmul.f32 %v1568_v52, %v1178_v54 }
 0x411   : > { %v1102_v29 = vperm.slane %v1094_v24, %v2016_v38 }
 0x412   : > { %v1106_v25 = vsel %vm373_vm1, %v1090_v22, %v1105_v21  ;;  %v1092_v26 = vsel %vm373_vm1, %v1091_v23, %v1073_v7  ;;  %v1103_v27 = vrot.slane %v1090_v22, 4  ;;  %v1180_v56 = vadd.f32 %v1568_v52, %v1179_v55 }
 0x413   : > { %v1114_v14 = vperm.slane %v1106_v25, %v2016_v38  ;;  %v1098_v17 = vperm.slane %v1092_v26, %v2016_v38  ;;  %v1121_v37 = vrot.slane %v1102_v29, 4 }
 0x414   : > { %v1104_v28 = vsel %vm373_vm1, %v1103_v27, %v1084_v13 }
 0x415   : > { %v1119_v31 = vrot.slane %v1114_v14, 4  ;;  %v1110_v32 = vperm.slane %v1104_v28, %v2016_v38  ;;  %v1117_v18 = vrot.slane %v1098_v17, 4  ;;  %v1122_v39 = vsel %vm373_vm1, %v1114_v14, %v1121_v37  ;;  %v1437_v38 = vld [vmem:[#allocation8] sm:$0xff] }
 0x416   : > { %1167 = vmatpush.bf16.msra.mxu1 %v1437_v38 }
 0x417   : > { %v1120_v33 = vsel %vm373_vm1, %v1119_v31, %v1102_v29  ;;  %v1115_v34 = vrot.slane %v1110_v32, 4  ;;  %v1118_v35 = vsel %vm373_vm1, %v1110_v32, %v1117_v18 }
 0x418   : > { %1128 = vrot.lane.b32.xlu1 %v1120_v33, %s1814_s6  ;;  %1124 = vrot.lane.b32.xlu2 %v1118_v35, %s1815_s29 }
 0x419   : > { %v1116_v36 = vsel %vm373_vm1, %v1115_v34, %v1098_v17  ;;  %vm1181_vm1 = vweird.f32 %v1568_v52 }
 0x41a   : > { %v1182_v57 = vsel %vm1181_vm1, %v1568_v52, %v1180_v56 }
 0x420   : > { %1132 = vrot.lane.b32.xlu2 %v1122_v39, %s1816_s30 }
 0x472   : > { %v1125_v41 = vpop.permute.xlu2 %1124 }
 0x473   : > { %v1135_v42 = vsel %vm746_vm2, %v1116_v36, %v1125_v41 }
 0x47a   : > { %v1133_v43 = vpop.permute.xlu2 %1132 }
 0x48a   : > { %v1129_v30 = vpop.permute.xlu1 %1128 }
 0x48b   : > { %v1137_v44 = vsel %vm1136_vm9, %v1135_v42, %v1129_v30 }
 0x48c   : > { %v1139_v45 = vsel %vm1138_vm10, %v1137_v44, %v1133_v43 }
 0x48d   : > { %v1140_v46 = vpack.c.bf16 %v1139_v45, %v1139_v45 }
 0x48f   : > { %1427 = vmatmul.msk.bf16.vlgmr.msra.gmra.mxu1 %vm344_vm0, %v1140_v46 }
 0x50c   : > { %v1169_v47 = vpop.f32.mrf.mxu1 }
 0x50d   : > { %v1170_v48 = vadd.f32 %v1169_v47, %v1996_v2 }
 0x50f   : > { %v1173_v49 = vsel %vm344_vm0, %v1170_v48, 0.0 }
 0x510   : > { %1174 = vadd.xlane.f32.xlu2 %v1173_v49 }
 0x514   : > { %v1171_v50 = vpop.f32.mrf.mxu1 }
 0x583   : > { %v1175_v58 = vpop.xlane.xlu2 %1174 }
 0x584   : > { %v1183_v59 = vmul.f32 %v1182_v57, %v1175_v58 }
 0x586   : > { %v1184_v2 = vsub.f32 %v1170_v48, %v1183_v59 }
 0x588   : > { %v1185_v60 = vmul.f32 %v1184_v2, %v1184_v2 }
 0x58a   : > { %v1186_v61 = vsel %vm344_vm0, %v1185_v60, 0.0 }
 0x58b   : > { %1187 = vadd.xlane.f32.xlu1 %v1186_v61 }
 0x58c   : > { %1718 = shalt.err (!%p1715_p10)
}
 0x58d   : > { %s1818_s6 = smov 4   ;;  %s1430_s29 = sshll.u32 %s1873_s25, 3 }
 0x58e   : > { %1453 = dma.vmem_to_hbm [thread:$0]  (%p1918_p4), %s1236_s11, 256, %s1238_s26, %s1209_s15, %s1813_s22, %s1813_s22, %s1818_s6  }
 0x58f   : > { %s1219_s3 = scalar_lea.hbm %s2290_s4, %s1430_s29  ;;  %s317_s22 = scalar_lea.vmem [#allocation10], %s1974_s27 }
 0x590   : > { %s1221_s11 = sshll.u32 %s317_s22, 4  ;;  %s1223_s8 = sshll.u32 %s1219_s3, 4  ;;  %s1222_s11 = int_to_ptr.vmem [resolvable:$true] %s1221_s11  ;;  %s1224_s8 = int_to_ptr.hbm [resolvable:$true] %s1223_s8 }
 0x591   : > { %s1204_s25 = scalar_lea.sflag [#allocation4], %s1971_s2  ;;  %s1733_s20 = sshra.s32 %s1224_s8, 4  ;;  %s1734_s20 = int_to_ptr.hbm [resolvable:$true] %s1733_s20 }
 0x592   : > { %s1735_s26 = scalar_lea.hbm %s1734_s20, 8  ;;  %s1739_s27 = scalar_lea.hbm %s2290_s4, 16 }
 0x593   : > { %p1736_p11 = scmp.ne.s32.totalorder %s1734_s20, %s1735_s26  ;;  %p1740_p0 = scmp.lt.s32.totalorder %s1734_s20, %s2290_s4 }
 0x594   : > { %p1741_p2 = scmp.lt.s32.totalorder %s1739_s27, %s1735_s26 }
 0x595   : > { %p1737_p5 = pnand %p1736_p11, %p1918_p4 }
 0x596   : > { %p1742_p1 = por %p1741_p2, %p1740_p0 }
 0x597   : > { %p1738_p13 = pneg %p1737_p5 }
 0x599   : > { %p1743_p3 = pnand %p1742_p1, %p1738_p13 }
 0x5fe   : > { %v1188_v62 = vpop.xlane.xlu1 %1187 }
 0x5ff   : > { %v1189_v63 = vmul.f32 %v1188_v62, %v1182_v57 }
 0x601   : > { %v1190_v0 = vadd.f32 1e-05, %v1189_v63 }
 0x603   : > { %1569 = vrsqrt.f32 %v1190_v0  ;;  %vm1197_vm11 = vweird.f32 %v1190_v0 }
 0x609   : > { %v1570_v1 = vpop.eup %1569 }
 0x60a   : > { %v1192_v3 = vmul.f32 %v1570_v1, %v1190_v0  ;;  %vm1198_vm2 = vweird.f32 %v1570_v1 }
 0x60b   : > { %vm1199_vm12 = vmor %vm1197_vm11, %vm1198_vm2 }
 0x60c   : > { %v1193_v4 = vmul.f32 %v1570_v1, %v1192_v3 }
 0x60e   : > { %v1194_v5 = vmul.f32 0.5, %v1193_v4 }
 0x610   : > { %v1195_v6 = vsub.f32 1.5, %v1194_v5 }
 0x612   : > { %v1196_v7 = vmul.f32 %v1570_v1, %v1195_v6 }
 0x614   : > { %v1200_v9 = vsel %vm1199_vm12, %v1570_v1, %v1196_v7 }
 0x615   : > { %v1201_v10 = vmul.f32 %v1200_v9, %v1184_v2 }
 0x617   : > { %1202 = vst.msk [vmem:[%s317_s22] sm:$0xff] %vm344_vm0, %v1201_v10 }
 0x618   : > { %1746 = shalt.err (!%p1743_p3)
}
 0x619   : > { %1452 = dma.vmem_to_hbm [thread:$0]  (%p1918_p4), %s1222_s11, 128, %s1224_s8, %s1204_s25  }
 0x61a PF: > { %s1252_s2 = sand.u32 1, %s1789_s18   ;;  %p2305_p12 = scmp.ge.s32.totalorder %s1801_s21, 2 }
 0x61b   : > { %s1253_s14 = scalar_lea.sflag [#allocation4], %s1252_s2 }
 0x61c   : > { %p1471_p7 = pnand %p2305_p12, %p1922_p6 }
 0x61e   : > { %p1472_p9 = pneg %p1471_p7 }
 0x620   : > { %1780 = dma.done.wait (%p1472_p9), %s1253_s14, 128  }
 0x621   : > { %1782 = vsyncadd (%p1472_p9), %s1253_s14, 4294967168  ;;  %s1263_s13 = scalar_lea.sflag [#allocation12], %s1252_s2 }
 0x622   : > { %1784 = dma.done.wait (%p1472_p9), %s1263_s13, 256  }
 0x623   : > { %1786 = vsyncadd (%p1472_p9), %s1263_s13, 4294967040  ;;  %s2306_s28 = sld [smem:[#allocation19_spill]]  ;;  %p26_p4 = scmp.ge.s32.totalorder %s1892_s12, 4  }
 0x624   : > { %s2307_s20 = sld [smem:[#allocation20_spill]]  ;;  %s2308_s18 = smov %s1793_s19 }
 0x625   : > { %s2310_s21 = smov %s1892_s12  ;;  %28 = sbr.rel (!%p26_p4) target bundleno = 13 (0xd), region = 119 }
 0x629   : > { %s2309_s19 = smov %s2306_s28 }
 0x62a   :  { %1269 = vsyncpa [#allocation3], 1 }
 0x62b   :  { %1271 = vsyncpa [#allocation3 + $0x1], 1 }
 0x62c   :  { %1272 = vsyncpa [#allocation6], 1 }
 0x62d   :  { %1274 = vsyncpa [#allocation6 + $0x1], 1 }
 0x62e   :  { %1275 = vsyncpa [#allocation9], 1 }
 0x62f   :  { %1276 = vsyncpa [#allocation4], 1 }
 0x630   :  { %1278 = vsyncpa [#allocation4 + $0x1], 1 }
 0x631   :  { %1279 = vsyncpa [#allocation12], 1 }
 0x632   :  { %1281 = vsyncpa [#allocation12 + $0x1], 1 }

</bundles_post_ra>
